<compile_context>
chip_gen: v7x
topology: tpu7x:2x2x1
jax: 0.10.0
libtpu: 0.0.40
codegen_flags: <defaults>
</compile_context>

<pallas_src>
import jax
import jax.numpy as jnp
from jax.experimental import pallas as pl
from jax.experimental.pallas import tpu as pltpu


def _round_up(x, m):
    return (x + m - 1) // m * m


def _fused_actor_critic_kernel(state_ref, lat_ref,
                               w1s_ref, w1l_ref, b1_ref,
                               w2_ref, b2_ref,
                               out_ref):
    """Fused actor+critic MLP on one batch tile.

    state_ref : [TILE_B, D_state]  fp32
    lat_ref   : [TILE_B, 1]        fp32
    w1s_ref   : [D_state, 2H]      bf16   (actor|critic first layers packed)
    w1l_ref   : [1, 2H]            bf16   (latency row of the first layer)
    b1_ref    : [1, 2H]            fp32
    w2_ref    : [2H, OUT_PAD]      bf16   (block-diag actor/critic heads, padded)
    b2_ref    : [1, OUT_PAD]       fp32
    out_ref   : [TILE_B, OUT_PAD]  fp32   (lane-dense; act/val sliced outside)
    """
    # First layer on the MXU (bf16 operands, fp32 accumulate) ...
    h = jnp.dot(state_ref[...].astype(jnp.bfloat16), w1s_ref[...],
                preferred_element_type=jnp.float32)
    # ... plus a rank-1 VPU update for the latency feature (replaces concat).
    h = h + lat_ref[...] * w1l_ref[...].astype(jnp.float32)
    # fp32 epilogue (bias + ReLU) on the VPU.
    h = jnp.maximum(h + b1_ref[...], 0.0)

    # Second layer: packed actor/critic heads in one lane-dense matmul.
    y = jnp.dot(h.astype(jnp.bfloat16), w2_ref[...],
                preferred_element_type=jnp.float32)
    out_ref[...] = y + b2_ref[...]


def actor_critic_with_latency(state, latency, packed, n_actions):
    """Forward-pass equivalent of ActorCriticWithLatency.forward.

    state   : [B, D_state] fp32
    latency : [B, 1]       fp32
    packed  : dict from pack_params()
    returns : (action_pred [B, A], value_pred [B, 1])
    """
    B, d_state = state.shape
    two_h = packed["w1s"].shape[1]
    out_pad = packed["w2"].shape[1]
    A = n_actions

    # Batch tiling: weights stay resident (constant block index); batch tiles
    # are double-buffered by the Pallas pipeline.
    tile_b = 512 if B >= 512 else _round_up(B, 8)
    b_pad = _round_up(B, tile_b)
    if b_pad != B:
        state = jnp.pad(state, ((0, b_pad - B), (0, 0)))
        latency = jnp.pad(latency, ((0, b_pad - B), (0, 0)))
    grid = (b_pad // tile_b,)

    cost = pl.CostEstimate(
        flops=2 * b_pad * (d_state * two_h + two_h * out_pad) + 2 * b_pad * two_h,
        transcendentals=0,
        bytes_accessed=(state.size * 4 + latency.size * 4
                        + packed["w1s"].size * 2 + packed["w1l"].size * 2
                        + packed["w2"].size * 2
                        + packed["b1"].size * 4 + packed["b2"].size * 4
                        + b_pad * out_pad * 4),
    )

    out = pl.pallas_call(
        _fused_actor_critic_kernel,
        out_shape=jax.ShapeDtypeStruct((b_pad, out_pad), jnp.float32),
        grid_spec=pltpu.PrefetchScalarGridSpec(
            num_scalar_prefetch=0,
            grid=grid,
            in_specs=[
                pl.BlockSpec((tile_b, d_state), lambda i: (i, 0)),
                pl.BlockSpec((tile_b, 1), lambda i: (i, 0)),
                pl.BlockSpec(packed["w1s"].shape, lambda i: (0, 0)),
                pl.BlockSpec(packed["w1l"].shape, lambda i: (0, 0)),
                pl.BlockSpec(packed["b1"].shape, lambda i: (0, 0)),
                pl.BlockSpec(packed["w2"].shape, lambda i: (0, 0)),
                pl.BlockSpec(packed["b2"].shape, lambda i: (0, 0)),
            ],
            out_specs=pl.BlockSpec((tile_b, out_pad), lambda i: (i, 0)),
        ),
        compiler_params=pltpu.CompilerParams(
            dimension_semantics=("parallel",),        # v7x: split batch over 2 TCs
            vmem_limit_bytes=32 * 1024 * 1024,        # safe under v7x's 64 MiB VMEM
        ),
        cost_estimate=cost,
    )(state, latency,
      packed["w1s"], packed["w1l"], packed["b1"], packed["w2"], packed["b2"])

    out = out[:B]
    return out[:, :A], out[:, A:A + 1]


def init_raw_params(key, d_in, hidden, n_actions):
    """Deterministic synthetic parameter init (Glorot-ish scaling), fp32."""
    ks = jax.random.split(key, 8)

    def lin(kw, fan_in, fan_out):
        scale = 1.0 / jnp.sqrt(jnp.float32(fan_in))
        return jax.random.uniform(kw, (fan_in, fan_out), jnp.float32,
                                  -scale, scale)

    return {
        # actor
        "w1a": lin(ks[0], d_in, hidden),
        "b1a": jax.random.uniform(ks[1], (1, hidden), jnp.float32, -0.1, 0.1),
        "w2a": lin(ks[2], hidden, n_actions),
        "b2a": jax.random.uniform(ks[3], (1, n_actions), jnp.float32, -0.1, 0.1),
        # critic
        "w1c": lin(ks[4], d_in, hidden),
        "b1c": jax.random.uniform(ks[5], (1, hidden), jnp.float32, -0.1, 0.1),
        "w2c": lin(ks[6], hidden, 1),
        "b2c": jax.random.uniform(ks[7], (1, 1), jnp.float32, -0.1, 0.1),
    }


def pack_params(raw, n_actions):
    """One-time packing: fuse actor/critic weights, pad head to lane width."""
    d_in, hidden = raw["w1a"].shape
    d_state = d_in - 1
    A = n_actions
    out_pad = _round_up(A + 1, 128)

    w1 = jnp.concatenate([raw["w1a"], raw["w1c"]], axis=1)        # [D_in, 2H]
    b1 = jnp.concatenate([raw["b1a"], raw["b1c"]], axis=1)        # [1, 2H]

    w2 = jnp.zeros((2 * hidden, out_pad), jnp.float32)            # block-diag pack
    w2 = w2.at[:hidden, :A].set(raw["w2a"])
    w2 = w2.at[hidden:, A:A + 1].set(raw["w2c"])
    b2 = jnp.zeros((1, out_pad), jnp.float32)
    b2 = b2.at[:, :A].set(raw["b2a"])
    b2 = b2.at[:, A:A + 1].set(raw["b2c"])

    return {
        "w1s": w1[:d_state].astype(jnp.bfloat16),    # [D_state, 2H]
        "w1l": w1[d_state:].astype(jnp.bfloat16),    # [1, 2H] latency row
        "b1": b1.astype(jnp.float32),                # [1, 2H]
        "w2": w2.astype(jnp.bfloat16),               # [2H, OUT_PAD]
        "b2": b2,                                    # [1, OUT_PAD]
    }


def _reference(state, latency, packed, n_actions):
    """Pure-JAX reference computing the same bf16-operand / fp32-accum math."""
    A = n_actions
    h = jnp.dot(state.astype(jnp.bfloat16), packed["w1s"],
                preferred_element_type=jnp.float32)
    h = h + latency * packed["w1l"].astype(jnp.float32)
    h = jnp.maximum(h + packed["b1"], 0.0)
    y = jnp.dot(h.astype(jnp.bfloat16), packed["w2"],
                preferred_element_type=jnp.float32) + packed["b2"]
    return y[:, :A], y[:, A:A + 1]


if __name__ == "__main__":
    B, D_STATE, HIDDEN, N_ACTIONS = 8, 31, 32, 8
    D_IN = D_STATE + 1  # state features + latency scalar

    key = jax.random.PRNGKey(0)
    k_state, k_lat, k_params = jax.random.split(key, 3)

    state = jax.random.normal(k_state, (B, D_STATE), jnp.float32)
    latency = jax.random.uniform(k_lat, (B, 1), jnp.float32, 0.0, 1.0)

    raw = init_raw_params(k_params, D_IN, HIDDEN, N_ACTIONS)
    packed = pack_params(raw, N_ACTIONS)

    action_pred, value_pred = actor_critic_with_latency(
        state, latency, packed, N_ACTIONS)
    jax.block_until_ready((action_pred, value_pred))

    ref_act, ref_val = _reference(state, latency, packed, N_ACTIONS)
    assert action_pred.shape == (B, N_ACTIONS)
    assert value_pred.shape == (B, 1)
    assert jnp.allclose(action_pred, ref_act, atol=1e-2, rtol=1e-2)
    assert jnp.allclose(value_pred, ref_val, atol=1e-2, rtol=1e-2)

    print("KERNEL_OK")
</pallas_src>

<mosaic_0001>
module attributes {stable_mosaic.version = 11 : i64} {
  func.func @_fused_actor_critic_kernel(%arg0: i32, %arg1: memref<8x31xf32, #tpu.memory_space<vmem>>, %arg2: memref<8x1xf32, #tpu.memory_space<vmem>>, %arg3: memref<31x64xbf16, #tpu.memory_space<vmem>>, %arg4: memref<1x64xbf16, #tpu.memory_space<vmem>>, %arg5: memref<1x64xf32, #tpu.memory_space<vmem>>, %arg6: memref<64x128xbf16, #tpu.memory_space<vmem>>, %arg7: memref<1x128xf32, #tpu.memory_space<vmem>>, %arg8: memref<8x128xf32, #tpu.memory_space<vmem>>) attributes {dimension_semantics = [#tpu.dimension_semantics<parallel>], iteration_bounds = array<i64: 1>, scalar_prefetch = 0 : i64, scratch_operands = 0 : i64, tpu.core_type = #tpu.core_type<tc>, window_params = [{transform_indices = @transform_0, window_bounds = array<i64: 8, 31>}, {transform_indices = @transform_1, window_bounds = array<i64: 8, 1>}, {pipeline_mode = #tpu.pipeline_mode<synchronous>, transform_indices = @transform_2, window_bounds = array<i64: 31, 64>}, {pipeline_mode = #tpu.pipeline_mode<synchronous>, transform_indices = @transform_3, window_bounds = array<i64: 1, 64>}, {pipeline_mode = #tpu.pipeline_mode<synchronous>, transform_indices = @transform_4, window_bounds = array<i64: 1, 64>}, {pipeline_mode = #tpu.pipeline_mode<synchronous>, transform_indices = @transform_5, window_bounds = array<i64: 64, 128>}, {pipeline_mode = #tpu.pipeline_mode<synchronous>, transform_indices = @transform_6, window_bounds = array<i64: 1, 128>}, {transform_indices = @transform_7, window_bounds = array<i64: 8, 128>}]} {
    %c0 = arith.constant 0 : index
    %c0_0 = arith.constant 0 : index
    %0 = vector.load %arg1[%c0, %c0_0] : memref<8x31xf32, #tpu.memory_space<vmem>>, vector<8x31xf32>
    %1 = arith.truncf %0 : vector<8x31xf32> to vector<8x31xbf16>
    %c0_1 = arith.constant 0 : index
    %c0_2 = arith.constant 0 : index
    %2 = vector.load %arg3[%c0_1, %c0_2] : memref<31x64xbf16, #tpu.memory_space<vmem>>, vector<31x64xbf16>
    %cst = arith.constant dense<0.000000e+00> : vector<8x64xf32>
    %3 = tpu.matmul %1, %2, %cst {dimension_numbers = #tpu.dot_dimension_numbers<[1], [0], [0], [1], [0, 0, 1, 1], [], []>} : vector<8x31xbf16>, vector<31x64xbf16>, vector<8x64xf32> -> vector<8x64xf32>
    %c0_3 = arith.constant 0 : index
    %c0_4 = arith.constant 0 : index
    %4 = vector.load %arg2[%c0_3, %c0_4] : memref<8x1xf32, #tpu.memory_space<vmem>>, vector<8x1xf32>
    %c0_5 = arith.constant 0 : index
    %c0_6 = arith.constant 0 : index
    %5 = vector.load %arg4[%c0_5, %c0_6] : memref<1x64xbf16, #tpu.memory_space<vmem>>, vector<1x64xbf16>
    %6 = arith.extf %5 : vector<1x64xbf16> to vector<1x64xf32>
    %7 = vector.broadcast %4 : vector<8x1xf32> to vector<8x64xf32>
    %8 = vector.broadcast %6 : vector<1x64xf32> to vector<8x64xf32>
    %9 = arith.mulf %7, %8 : vector<8x64xf32>
    %10 = arith.addf %3, %9 : vector<8x64xf32>
    %c0_7 = arith.constant 0 : index
    %c0_8 = arith.constant 0 : index
    %11 = vector.load %arg5[%c0_7, %c0_8] : memref<1x64xf32, #tpu.memory_space<vmem>>, vector<1x64xf32>
    %12 = vector.broadcast %11 : vector<1x64xf32> to vector<8x64xf32>
    %13 = arith.addf %10, %12 : vector<8x64xf32>
    %cst_9 = arith.constant 0.000000e+00 : f32
    %14 = vector.broadcast %cst_9 : f32 to vector<8x64xf32>
    %15 = arith.maximumf %13, %14 : vector<8x64xf32>
    %16 = arith.truncf %15 : vector<8x64xf32> to vector<8x64xbf16>
    %c0_10 = arith.constant 0 : index
    %c0_11 = arith.constant 0 : index
    %17 = vector.load %arg6[%c0_10, %c0_11] : memref<64x128xbf16, #tpu.memory_space<vmem>>, vector<64x128xbf16>
    %cst_12 = arith.constant dense<0.000000e+00> : vector<8x128xf32>
    %18 = tpu.matmul %16, %17, %cst_12 {dimension_numbers = #tpu.dot_dimension_numbers<[1], [0], [0], [1], [0, 0, 1, 1], [], []>} : vector<8x64xbf16>, vector<64x128xbf16>, vector<8x128xf32> -> vector<8x128xf32>
    %c0_13 = arith.constant 0 : index
    %c0_14 = arith.constant 0 : index
    %19 = vector.load %arg7[%c0_13, %c0_14] : memref<1x128xf32, #tpu.memory_space<vmem>>, vector<1x128xf32>
    %20 = vector.broadcast %19 : vector<1x128xf32> to vector<8x128xf32>
    %21 = arith.addf %18, %20 : vector<8x128xf32>
    %c0_15 = arith.constant 0 : index
    %c0_16 = arith.constant 0 : index
    %22 = vector.load %arg8[%c0_15, %c0_16] : memref<8x128xf32, #tpu.memory_space<vmem>>, vector<8x128xf32>
    tpu.vector_store %arg8[%c0_15, %c0_16], %21 {strides = array<i32>} : memref<8x128xf32, #tpu.memory_space<vmem>>, vector<8x128xf32>,
    return
  }
  func.func @transform_0(%arg0: i32) -> (i32, i32) {
    %c0_i32 = arith.constant 0 : i32
    %c0_i32_0 = arith.constant 0 : i32
    return %arg0, %c0_i32 : i32, i32
  }
  func.func @transform_1(%arg0: i32) -> (i32, i32) {
    %c0_i32 = arith.constant 0 : i32
    %c0_i32_0 = arith.constant 0 : i32
    return %arg0, %c0_i32 : i32, i32
  }
  func.func @transform_2(%arg0: i32) -> (i32, i32) {
    %c0_i32 = arith.constant 0 : i32
    %c0_i32_0 = arith.constant 0 : i32
    %c0_i32_1 = arith.constant 0 : i32
    return %c0_i32, %c0_i32_0 : i32, i32
  }
  func.func @transform_3(%arg0: i32) -> (i32, i32) {
    %c0_i32 = arith.constant 0 : i32
    %c0_i32_0 = arith.constant 0 : i32
    %c0_i32_1 = arith.constant 0 : i32
    return %c0_i32, %c0_i32_0 : i32, i32
  }
  func.func @transform_4(%arg0: i32) -> (i32, i32) {
    %c0_i32 = arith.constant 0 : i32
    %c0_i32_0 = arith.constant 0 : i32
    %c0_i32_1 = arith.constant 0 : i32
    return %c0_i32, %c0_i32_0 : i32, i32
  }
  func.func @transform_5(%arg0: i32) -> (i32, i32) {
    %c0_i32 = arith.constant 0 : i32
    %c0_i32_0 = arith.constant 0 : i32
    %c0_i32_1 = arith.constant 0 : i32
    return %c0_i32, %c0_i32_0 : i32, i32
  }
  func.func @transform_6(%arg0: i32) -> (i32, i32) {
    %c0_i32 = arith.constant 0 : i32
    %c0_i32_0 = arith.constant 0 : i32
    %c0_i32_1 = arith.constant 0 : i32
    return %c0_i32, %c0_i32_0 : i32, i32
  }
  func.func @transform_7(%arg0: i32) -> (i32, i32) {
    %c0_i32 = arith.constant 0 : i32
    %c0_i32_0 = arith.constant 0 : i32
    return %arg0, %c0_i32 : i32, i32
  }
}

</mosaic_0001>

<bundles_post_ra>
// kernel: tpu_custom_call.1
= control target key start
LH: loop header
LB: loop body
LE: loop exit
PB: predicated region body
PF: predicated region fallthrough
CT: control target
= control target key end

     0   :  { %12 = vsyncpa [#allocation3], 0  ;;  %s481_s0 = inlined_call_operand.hbm [shape: f32[8,31], index: 0, kind: input, shape index: {}]   ;;  %s482_s1 = inlined_call_operand.vmem [shape: f32[8,1], index: 1, kind: input, shape index: {}]   ;;  %s483_s2 = inlined_call_operand.vmem [shape: bf16[31,64], index: 2, kind: input, shape index: {}]   ;;  %s484_s3 = inlined_call_operand.vmem [shape: bf16[1,64], index: 3, kind: input, shape index: {}]   ;;  %s485_s4 = inlined_call_operand.vmem [shape: f32[1,64], index: 4, kind: input, shape index: {}]   ;;  %s486_s5 = inlined_call_operand.hbm [shape: bf16[64,128], index: 5, kind: input, shape index: {}]   ;;  %s487_s6 = inlined_call_operand.vmem [shape: f32[1,128], index: 6, kind: input, shape index: {}]   ;;  %s488_s7 = inlined_call_operand.hbm [shape: f32[8,128], index: 7, kind: output, shape index: {}]  }
   0x1   :  { %13 = vsyncpa [#allocation6], 0 }
   0x2   :  { %14 = vsyncpa [#allocation4], 0  ;;  %s371_s24 = smov [#allocation2]   ;;  %s372_s26 = smov [#allocation5]  }
   0x3   :  { %s21_s25 = sshll.u32 %s371_s24, 4  ;;  %s38_s27 = sshll.u32 %s372_s26, 4  ;;  %s22_s25 = int_to_ptr.vmem [resolvable:$true] %s21_s25  ;;  %s420_s27 = int_to_ptr.vmem [resolvable:$true] %s38_s27 }
   0x4   :  { %s299_s30 = scalar_lea.hbm %s481_s0, 128 }
   0x5   :  { %p300_p0 = scmp.ne.s32.totalorder %s481_s0, %s299_s30  ;;  %p303_p1 = scmp.lt.u32.totalorder %s299_s30, %s481_s0 }
   0x7   :  { %p305_p2 = pnand %p303_p1, %p300_p0 }
   0x9   :  { %308 = shalt.err (!%p305_p2)
}
   0xa   :  { %s309_s12 = scalar_lea.vmem %s22_s25, 128  ;;  %p314_p4 = scmp.lt.s32.totalorder %s22_s25, %s22_s25 }
   0xb   :  { %p310_p3 = scmp.ne.s32.totalorder %s22_s25, %s309_s12  ;;  %p315_p5 = scmp.lt.s32.totalorder %s309_s12, %s309_s12 }
   0xd   :  { %p316_p6 = por %p315_p5, %p314_p4 }
   0xf   :  { %p317_p7 = pnand %p316_p6, %p310_p3 }
  0x11   :  { %320 = shalt.err (!%p317_p7)
}
  0x12   :  { %24 = dma.hbm_to_vmem [thread:$0]  %s481_s0, 128, %s22_s25, [#allocation3]  }
  0x13   :  { %s321_s17 = scalar_lea.hbm %s486_s5, 512 }
  0x14   :  { %p322_p8 = scmp.ne.s32.totalorder %s486_s5, %s321_s17  ;;  %p325_p9 = scmp.lt.u32.totalorder %s321_s17, %s486_s5 }
  0x16   :  { %p327_p10 = pnand %p325_p9, %p322_p8 }
  0x18   :  { %330 = shalt.err (!%p327_p10)
}
  0x19   :  { %s331_s22 = scalar_lea.vmem %s420_s27, 512  ;;  %p336_p12 = scmp.lt.s32.totalorder %s420_s27, %s420_s27 }
  0x1a   :  { %p332_p11 = scmp.ne.s32.totalorder %s420_s27, %s331_s22  ;;  %p337_p13 = scmp.lt.s32.totalorder %s331_s22, %s331_s22 }
  0x1c   :  { %p338_p0 = por %p337_p13, %p336_p12 }
  0x1e   :  { %p339_p1 = pnand %p338_p0, %p332_p11 }
  0x20   :  { %342 = shalt.err (!%p339_p1)
}
  0x21   :  { %s373_s0 = smov 64   ;;  %s374_s23 = smov 4  }
  0x22   :  { %44 = dma.hbm_to_vmem [thread:$0]  %s486_s5, 512, %s420_s27, [#allocation6], %s373_s0, %s373_s0, %s374_s23  }
  0x23   :  { %365 = dma.done.wait [#allocation3], 128  }
  0x24   :  { %366 = vsyncadd [#allocation3], 4294967168 }
  0x25   :  { %367 = dma.done.wait [#allocation6], 512  }
  0x26   :  { %368 = vsyncadd [#allocation6], 4294966784  ;;  %v375_v0 = vmov 0.0   ;;  %vm88_vm0 = vcmask 1046528   ;;  %vm376_vm1 = vmmov 0   ;;  %v377_v1 = vmov 0  }
  0x27   :  { %263 = vmatprep.subr.bf16.mxu0 %v375_v0  ;;  %271 = vmatprep.subr.bf16.mxu1 %v375_v0  ;;  %vm89_vm2 = vcmask 1047552   ;;  %v378_v2 = vmov 65535   ;;  %v293_v4 = vld [vmem:[%s483_s2] sm:$0xff]   ;;  %v294_v6 = vld [vmem:[%s483_s2 + $0x8] sm:$0xff]   ;;  %v296_v11 = vld [vmem:[#allocation5 + $0x8] sm:$0xff]   ;;  %vm84_vm3 = vcmask 252928   ;;  %v68_v15 = vlaneseq }
  0x28   :  { %267 = vmatprep.mubr.msk.bf16.mxu0 %vm376_vm1, %v375_v0  ;;  %292 = vset.pattern.permute.xlu0 %v377_v1  ;;  %v90_v3 = vsel %vm88_vm0, 4294967295, %v378_v2  ;;  %v54_v7 = vld [vmem:[#allocation2] sm:$0xff]  ;;  %v295_v10 = vld [vmem:[#allocation5] sm:$0xff]   ;;  %v297_v13 = vld [vmem:[#allocation5 + $0x10] sm:$0xff]   ;;  %vm184_vm4 = vcmask 523264   ;;  %s379_s11 = smov [#allocation7]  }
  0x29   :  { %279 = vmatprep.mubr.msk.bf16.mxu1 %vm376_vm1, %v375_v0  ;;  %v91_v5 = vsel %vm89_vm2, %v90_v3, 0  ;;  %264 = vmatpush3.bf16.msra.mxu0 %v293_v4  ;;  %v60_v8 = vld [vmem:[%s482_s1] sm:$0xff]  ;;  %v55_v12 = vpack.c.bf16 %v54_v7, %v54_v7  ;;  %v69_v16 = vshrl.u32 %v68_v15, 7  ;;  %s235_s12 = sshll.u32 %s379_s11, 4  ;;  %s236_s12 = int_to_ptr.vmem [resolvable:$true] %s235_s12 }
  0x2a   :  { %265 = vmatprep.subr.bf16.mxu0 %v375_v0  ;;  %v93_v9 = vand.u32 %v294_v6, %v91_v5  ;;  %65 = vperm.xlu0 %292, %v60_v8   ;;  %v298_v14 = vld [vmem:[#allocation5 + $0x18] sm:$0xff]   ;;  %p348_p3 = scmp.lt.s32.totalorder %s236_s12, %s236_s12 }
  0x2b   :  { %272 = vmatpush3.bf16.msra.mxu1 %v295_v10  ;;  %v61_v17 = vld [vmem:[%s484_s3] sm:$0x1]  ;;  %v70_v19 = vsub.s32 0, %v69_v16 }
  0x2c   :  { %273 = vmatprep.subr.bf16.mxu1 %v375_v0  ;;  %v62_v18 = vunpack.c.l.bf16 %v61_v17  ;;  %v248_v24 = vld [vmem:[%s485_s4] ss:$0 sm:$0xff]  ;;  %s343_s4 = scalar_lea.vmem %s236_s12, 128 }
  0x2d   :  { %266 = vmatpush3.bf16.msra.mxu0 %v93_v9  ;;  %v249_v32 = vld [vmem:[%s487_s6] ss:$0 sm:$0xff]  ;;  %p344_p2 = scmp.ne.s32.totalorder %s236_s12, %s343_s4  ;;  %p349_p4 = scmp.lt.s32.totalorder %s343_s4, %s343_s4 }
  0x2e   :  { %v71_v20 = vrot.slane %v62_v18, %v70_v19 }
  0x2f   :  { %274 = vmatpush3.bf16.msra.mxu1 %v296_v11  ;;  %p350_p5 = por %p349_p4, %p348_p3 }
  0x30   :  { %268 = vmatmul.mubr.msk.bf16.vlgmr.msra.gmra.mrb[0].mxu0 %vm84_vm3, %v55_v12  ;;  %275 = vmatprep.subr.bf16.mxu1 %v375_v0 }
  0x31   :  { %p351_p6 = pnand %p350_p5, %p344_p2 }
  0x33   :  { %276 = vmatpush3.bf16.msra.mxu1 %v297_v13 }
  0x34   :  { %277 = vmatprep.subr.bf16.mxu1 %v375_v0 }
  0x37   :  { %278 = vmatpush3.bf16.msra.mxu1 %v298_v14 }
  0xa9   :  { %v66_v21 = vpop.permute.xlu0 %65 }
  0xaa   :  { %v72_v22 = vmul.f32 %v71_v20, %v66_v21 }
 0x103   :  { %v129_v23 = vpop.f32.mrb[0].mxu0 }
 0x104   :  { %v130_v25 = vadd.f32 %v129_v23, %v72_v22  ;;  %v269_v26 = vpop.f32.mrb[1].mxu0 }
 0x105   :  { %v132_v27 = vpop.f32.mrb[2].mxu0 }
 0x106   :  { %v142_v28 = vadd.f32 %v248_v24, %v130_v25  ;;  %v270_v29 = vpop.f32.mrb[3].mxu0 }
 0x108   :  { %v143_v30 = vmax.f32 %v142_v28, 0.0 }
 0x10a   :  { %v144_v31 = vpack.c.bf16 %v143_v30, %v143_v30 }
 0x10c   :  { %280 = vmatmul.mubr.msk.bf16.vlgmr.msra.gmra.mrb[0].mxu1 %vm184_vm4, %v144_v31 }
 0x1df   :  { %v222_v33 = vpop.f32.mrb[0].mxu1 }
 0x1e0   :  { %v223_v34 = vadd.f32 %v249_v32, %v222_v33  ;;  %v281_v35 = vpop.f32.mrb[1].mxu1 }
 0x1e1   :  { %v225_v36 = vpop.f32.mrb[2].mxu1 }
 0x1e2   :  { %228 = vst [vmem:[#allocation7] sm:$0xff] %v223_v34  ;;  %v282_v37 = vpop.f32.mrb[3].mxu1 }
 0x1e3   :  { %354 = shalt.err (!%p351_p6)
}
 0x1e4   :  { %s355_s6 = scalar_lea.hbm %s488_s7, 128 }
 0x1e5   :  { %p356_p7 = scmp.ne.s32.totalorder %s488_s7, %s355_s6  ;;  %p359_p8 = scmp.lt.u32.totalorder %s355_s6, %s488_s7 }
 0x1e7   :  { %p361_p9 = pnand %p359_p8, %p356_p7 }
 0x1e9   :  { %364 = shalt.err (!%p361_p9)
}
 0x1ea   :  { %238 = dma.vmem_to_hbm [thread:$0]  %s236_s12, 128, %s488_s7, [#allocation4]  }
 0x1eb   :  { %369 = dma.done.wait [#allocation4], 128  }
 0x1ec   :  { %370 = vsyncadd [#allocation4], 4294967168 }
 0x1ed   :  { %242 = vsyncpa [#allocation3], 1 }
 0x1ee   :  { %243 = vsyncpa [#allocation6], 1 }
 0x1ef   :  { %244 = vsyncpa [#allocation4], 1 }

</bundles_post_ra>
